<compile_context>
chip_gen: v5e
topology: v5e:2x2
jax: 0.10.0
libtpu: 0.0.40
codegen_flags: <defaults>
</compile_context>

<pallas_src>
import math

import jax
import jax.numpy as jnp
from jax import lax
from jax.experimental import pallas as pl
from jax.experimental.pallas import tpu as pltpu


_LANE = 128     # pad in_features / out_features to multiples of this
_SUBLANE = 8    # pad batch to multiples of this


def _round_up(x, m):
    return ((x + m - 1) // m) * m


def _pick_tile(dim_pad, max_tile):
    """Largest multiple of 128 that divides dim_pad and is <= max_tile."""
    t = min(dim_pad, max_tile)
    t = (t // _LANE) * _LANE
    while dim_pad % t != 0:
        t -= _LANE
    return t


# ----------------------------------------------------------------------------
# Pallas kernels
# ----------------------------------------------------------------------------
def _noisy_linear_train_kernel(x_ref, wmu_ref, wsig_ref, weps_ref,
                               bmu_ref, bsig_ref, beps_ref, o_ref, acc_ref):
    """Training-mode forward, one (n, k) grid step:
         acc += x_tile @ (W_mu + W_sigma * W_eps)_tile          (W already (K,N))
       finalize (last k): out = acc + (b_mu + b_sigma * b_eps)
    """
    k = pl.program_id(1)

    @pl.when(k == 0)
    def _():
        acc_ref[...] = jnp.zeros_like(acc_ref)

    # Noisy weight composition on the VPU, matmul on the MXU (no transpose).
    w = wmu_ref[...] + wsig_ref[...] * weps_ref[...]          # (tk, tn)
    acc_ref[...] += jnp.dot(x_ref[...], w,
                            preferred_element_type=jnp.float32)

    @pl.when(k == pl.num_programs(1) - 1)
    def _():
        b = bmu_ref[...] + bsig_ref[...] * beps_ref[...]      # (1, tn), once
        o_ref[...] = (acc_ref[...] + b).astype(o_ref.dtype)


def _noisy_linear_eval_kernel(x_ref, wmu_ref, bmu_ref, o_ref, acc_ref):
    """Eval-mode forward: y = x @ W_mu + b_mu  (W_mu already (K, N))."""
    k = pl.program_id(1)

    @pl.when(k == 0)
    def _():
        acc_ref[...] = jnp.zeros_like(acc_ref)

    acc_ref[...] += jnp.dot(x_ref[...], wmu_ref[...],
                            preferred_element_type=jnp.float32)

    @pl.when(k == pl.num_programs(1) - 1)
    def _():
        o_ref[...] = (acc_ref[...] + bmu_ref[...]).astype(o_ref.dtype)


# ----------------------------------------------------------------------------
# Wrapper
# ----------------------------------------------------------------------------
def noisy_linear_forward(x, packed, *, training=True, max_tn=512, max_tk=512):
    """Pallas-backed NoisyLinear forward.

    x:       (B, in_features) float32
    packed:  output of pack_noisy_linear_params (pre-transposed, lane-padded)
    """
    B, in_f = x.shape
    assert in_f == packed["in_features"]
    K_pad, N_pad = packed["weight_mu_t"].shape
    out_f = packed["out_features"]

    B_pad = _round_up(B, _SUBLANE)
    xp = x
    if B_pad != B or K_pad != in_f:
        xp = jnp.pad(x, ((0, B_pad - B), (0, K_pad - in_f)))

    tn = _pick_tile(N_pad, max_tn)
    tk = _pick_tile(K_pad, max_tk)
    grid = (N_pad // tn, K_pad // tk)

    n_w = 3 if training else 1
    # double-buffered weights + x + out + biases, plus the f32 accumulator
    est_bytes = 4 * (n_w * 2 * tk * tn + 2 * B_pad * tk + 2 * B_pad * tn
                     + n_w * 2 * _SUBLANE * tn + B_pad * tn)
    vmem_limit = min(max(2 * est_bytes, 16 * 1024 * 1024), 50 * 1024 * 1024)

    x_spec = pl.BlockSpec((B_pad, tk), lambda n, k: (0, k))
    w_spec = pl.BlockSpec((tk, tn), lambda n, k: (k, n))
    b_spec = pl.BlockSpec((1, tn), lambda n, k: (0, n))
    o_spec = pl.BlockSpec((B_pad, tn), lambda n, k: (0, n))

    if training:
        kernel = _noisy_linear_train_kernel
        in_specs = [x_spec, w_spec, w_spec, w_spec, b_spec, b_spec, b_spec]
        args = (xp,
                packed["weight_mu_t"], packed["weight_sigma_t"],
                packed["weight_epsilon_t"],
                packed["bias_mu"], packed["bias_sigma"], packed["bias_epsilon"])
    else:
        kernel = _noisy_linear_eval_kernel
        in_specs = [x_spec, w_spec, b_spec]
        args = (xp, packed["weight_mu_t"], packed["bias_mu"])

    y = pl.pallas_call(
        kernel,
        out_shape=jax.ShapeDtypeStruct((B_pad, N_pad), x.dtype),
        grid_spec=pltpu.PrefetchScalarGridSpec(
            num_scalar_prefetch=0,
            grid=grid,
            in_specs=in_specs,
            out_specs=o_spec,
            scratch_shapes=[pltpu.VMEM((B_pad, tn), jnp.float32)],
        ),
        compiler_params=pltpu.CompilerParams(
            dimension_semantics=("parallel", "arbitrary"),
            vmem_limit_bytes=vmem_limit,
        ),
    )(*args)

    return y[:B, :out_f]


# ----------------------------------------------------------------------------
# Parameter / noise initialization (mirrors the PyTorch module, f32 layout)
# ----------------------------------------------------------------------------
def _scale_noise(key, size):
    x = jax.random.normal(key, (size,), dtype=jnp.float32)
    return jnp.sign(x) * jnp.sqrt(jnp.abs(x))


def init_noisy_linear(key, in_features, out_features, std_init=0.1,
                      factorized=False):
    """Returns params in PyTorch layout: weights (out, in), biases (out,)."""
    k_wmu, k_bmu, k_eps_w, k_eps_b = jax.random.split(key, 4)

    mu_range = 1.0 / math.sqrt(in_features)
    weight_mu = jax.random.uniform(
        k_wmu, (out_features, in_features), jnp.float32,
        minval=-mu_range, maxval=mu_range)
    bias_mu = jax.random.uniform(
        k_bmu, (out_features,), jnp.float32, minval=-mu_range, maxval=mu_range)

    weight_sigma = jnp.full((out_features, in_features),
                            std_init / math.sqrt(in_features), jnp.float32)
    bias_sigma = jnp.full((out_features,),
                          std_init / math.sqrt(out_features), jnp.float32)

    if factorized:
        eps_in = _scale_noise(k_eps_w, in_features)
        eps_out = _scale_noise(k_eps_b, out_features)
        weight_epsilon = jnp.outer(eps_out, eps_in)
        bias_epsilon = eps_out
    else:
        weight_epsilon = jax.random.normal(
            k_eps_w, (out_features, in_features), jnp.float32)
        bias_epsilon = jax.random.normal(k_eps_b, (out_features,), jnp.float32)

    return {
        "weight_mu": weight_mu,
        "weight_sigma": weight_sigma,
        "weight_epsilon": weight_epsilon,
        "bias_mu": bias_mu,
        "bias_sigma": bias_sigma,
        "bias_epsilon": bias_epsilon,
    }


def pack_noisy_linear_params(raw):
    """One-time repack: transpose weights to (in, out) and zero-pad in/out
    features to multiples of 128 so the kernel sees lane-dense, MXU-native
    tiles with no in-kernel transpose."""
    out_f, in_f = raw["weight_mu"].shape
    K_pad = _round_up(in_f, _LANE)
    N_pad = _round_up(out_f, _LANE)

    def pack_w(w):                      # (out, in) -> (K_pad, N_pad)
        wt = w.T
        return jnp.pad(wt, ((0, K_pad - in_f), (0, N_pad - out_f)))

    def pack_b(b):                      # (out,) -> (1, N_pad)
        return jnp.pad(b.reshape(1, out_f), ((0, 0), (0, N_pad - out_f)))

    return {
        "weight_mu_t": pack_w(raw["weight_mu"]),
        "weight_sigma_t": pack_w(raw["weight_sigma"]),
        "weight_epsilon_t": pack_w(raw["weight_epsilon"]),
        "bias_mu": pack_b(raw["bias_mu"]),
        "bias_sigma": pack_b(raw["bias_sigma"]),
        "bias_epsilon": pack_b(raw["bias_epsilon"]),
        "in_features": in_f,
        "out_features": out_f,
    }


# ----------------------------------------------------------------------------
# Reference + test
# ----------------------------------------------------------------------------
def _reference(x, raw, training):
    if training:
        w = raw["weight_mu"] + raw["weight_sigma"] * raw["weight_epsilon"]
        b = raw["bias_mu"] + raw["bias_sigma"] * raw["bias_epsilon"]
    else:
        w = raw["weight_mu"]
        b = raw["bias_mu"]
    return jnp.dot(x, w.T, precision=lax.Precision.HIGHEST) + b[None, :]


def _check(x, raw, packed, **fwd_kwargs):
    for training in (True, False):
        y = noisy_linear_forward(x, packed, training=training, **fwd_kwargs)
        y = jax.block_until_ready(y)
        ref = _reference(x, raw, training)
        assert y.shape == ref.shape, (y.shape, ref.shape)
        assert jnp.allclose(y, ref, atol=1e-3, rtol=1e-3), (
            float(jnp.max(jnp.abs(y - ref))))


if __name__ == "__main__":
    key = jax.random.PRNGKey(0)
    k1, k2, kx1, kx2 = jax.random.split(key, 4)

    # Case 1: tiny layer (original example shapes), single (128,128) tile.
    B1, IN1, OUT1 = 8, 32, 64
    raw1 = init_noisy_linear(k1, IN1, OUT1, std_init=0.1, factorized=False)
    packed1 = pack_noisy_linear_params(raw1)
    x1 = jax.random.normal(kx1, (B1, IN1), dtype=jnp.float32)
    _check(x1, raw1, packed1)

    # Case 2: exercises the multi-tile grid (N=2 x K=3), K-accumulation,
    # bias-added-once finalize, and batch padding (6 -> 8).
    B2, IN2, OUT2 = 6, 384, 256
    raw2 = init_noisy_linear(k2, IN2, OUT2, std_init=0.1, factorized=True)
    packed2 = pack_noisy_linear_params(raw2)
    x2 = jax.random.normal(kx2, (B2, IN2), dtype=jnp.float32)
    _check(x2, raw2, packed2, max_tn=128, max_tk=128)

    print("KERNEL_OK")
</pallas_src>

<mosaic_0001>
module attributes {stable_mosaic.version = 11 : i64} {
  func.func @_noisy_linear_train_kernel(%arg0: i32, %arg1: i32, %arg2: memref<8x128xf32, #tpu.memory_space<vmem>>, %arg3: memref<128x128xf32, #tpu.memory_space<vmem>>, %arg4: memref<128x128xf32, #tpu.memory_space<vmem>>, %arg5: memref<128x128xf32, #tpu.memory_space<vmem>>, %arg6: memref<1x128xf32, #tpu.memory_space<vmem>>, %arg7: memref<1x128xf32, #tpu.memory_space<vmem>>, %arg8: memref<1x128xf32, #tpu.memory_space<vmem>>, %arg9: memref<8x128xf32, #tpu.memory_space<vmem>>, %arg10: memref<8x128xf32, #tpu.memory_space<vmem>>) attributes {dimension_semantics = [#tpu.dimension_semantics<parallel>, #tpu.dimension_semantics<arbitrary>], iteration_bounds = array<i64: 1, 1>, scalar_prefetch = 0 : i64, scratch_operands = 1 : i64, tpu.core_type = #tpu.core_type<tc>, window_params = [{transform_indices = @transform_0, window_bounds = array<i64: 8, 128>}, {transform_indices = @transform_1, window_bounds = array<i64: 128, 128>}, {transform_indices = @transform_2, window_bounds = array<i64: 128, 128>}, {transform_indices = @transform_3, window_bounds = array<i64: 128, 128>}, {transform_indices = @transform_4, window_bounds = array<i64: 1, 128>}, {transform_indices = @transform_5, window_bounds = array<i64: 1, 128>}, {transform_indices = @transform_6, window_bounds = array<i64: 1, 128>}, {transform_indices = @transform_7, window_bounds = array<i64: 8, 128>}]} {
    %c0_i32 = arith.constant 0 : i32
    %0 = arith.cmpi eq, %arg1, %c0_i32 : i32
    %1 = arith.extui %0 : i1 to i32
    %c0_i32_0 = arith.constant 0 : i32
    %2 = arith.cmpi ne, %1, %c0_i32_0 : i32
    scf.if %2 {
      %cst_14 = arith.constant 0.000000e+00 : f32
      %16 = vector.broadcast %cst_14 : f32 to vector<8x128xf32>
      %c0_15 = arith.constant 0 : index
      %c0_16 = arith.constant 0 : index
      %17 = vector.load %arg10[%c0_15, %c0_16] : memref<8x128xf32, #tpu.memory_space<vmem>>, vector<8x128xf32>
      tpu.vector_store %arg10[%c0_15, %c0_16], %16 {strides = array<i32>} : memref<8x128xf32, #tpu.memory_space<vmem>>, vector<8x128xf32>,
    } else {
    }
    %c0 = arith.constant 0 : index
    %c0_1 = arith.constant 0 : index
    %3 = vector.load %arg3[%c0, %c0_1] : memref<128x128xf32, #tpu.memory_space<vmem>>, vector<128x128xf32>
    %c0_2 = arith.constant 0 : index
    %c0_3 = arith.constant 0 : index
    %4 = vector.load %arg4[%c0_2, %c0_3] : memref<128x128xf32, #tpu.memory_space<vmem>>, vector<128x128xf32>
    %c0_4 = arith.constant 0 : index
    %c0_5 = arith.constant 0 : index
    %5 = vector.load %arg5[%c0_4, %c0_5] : memref<128x128xf32, #tpu.memory_space<vmem>>, vector<128x128xf32>
    %6 = arith.mulf %4, %5 : vector<128x128xf32>
    %7 = arith.addf %3, %6 : vector<128x128xf32>
    %c0_6 = arith.constant 0 : index
    %c0_7 = arith.constant 0 : index
    %8 = vector.load %arg10[%c0_6, %c0_7] : memref<8x128xf32, #tpu.memory_space<vmem>>, vector<8x128xf32>
    %c0_8 = arith.constant 0 : index
    %c0_9 = arith.constant 0 : index
    %9 = vector.load %arg2[%c0_8, %c0_9] : memref<8x128xf32, #tpu.memory_space<vmem>>, vector<8x128xf32>
    %cst = arith.constant dense<0.000000e+00> : vector<8x128xf32>
    %10 = tpu.matmul %9, %7, %cst {dimension_numbers = #tpu.dot_dimension_numbers<[1], [0], [0], [1], [0, 0, 1, 1], [], []>} : vector<8x128xf32>, vector<128x128xf32>, vector<8x128xf32> -> vector<8x128xf32>
    %11 = arith.addf %8, %10 : vector<8x128xf32>
    %c0_10 = arith.constant 0 : index
    %c0_11 = arith.constant 0 : index
    %12 = vector.load %arg10[%c0_10, %c0_11] : memref<8x128xf32, #tpu.memory_space<vmem>>, vector<8x128xf32>
    tpu.vector_store %arg10[%c0_10, %c0_11], %11 {strides = array<i32>} : memref<8x128xf32, #tpu.memory_space<vmem>>, vector<8x128xf32>,
    %c0_i32_12 = arith.constant 0 : i32
    %13 = arith.cmpi eq, %arg1, %c0_i32_12 : i32
    %14 = arith.extui %13 : i1 to i32
    %c0_i32_13 = arith.constant 0 : i32
    %15 = arith.cmpi ne, %14, %c0_i32_13 : i32
    scf.if %15 {
      %c0_14 = arith.constant 0 : index
      %c0_15 = arith.constant 0 : index
      %16 = vector.load %arg6[%c0_14, %c0_15] : memref<1x128xf32, #tpu.memory_space<vmem>>, vector<1x128xf32>
      %c0_16 = arith.constant 0 : index
      %c0_17 = arith.constant 0 : index
      %17 = vector.load %arg7[%c0_16, %c0_17] : memref<1x128xf32, #tpu.memory_space<vmem>>, vector<1x128xf32>
      %c0_18 = arith.constant 0 : index
      %c0_19 = arith.constant 0 : index
      %18 = vector.load %arg8[%c0_18, %c0_19] : memref<1x128xf32, #tpu.memory_space<vmem>>, vector<1x128xf32>
      %19 = arith.mulf %17, %18 : vector<1x128xf32>
      %20 = arith.addf %16, %19 : vector<1x128xf32>
      %c0_20 = arith.constant 0 : index
      %c0_21 = arith.constant 0 : index
      %21 = vector.load %arg10[%c0_20, %c0_21] : memref<8x128xf32, #tpu.memory_space<vmem>>, vector<8x128xf32>
      %22 = vector.broadcast %20 : vector<1x128xf32> to vector<8x128xf32>
      %23 = arith.addf %21, %22 : vector<8x128xf32>
      %c0_22 = arith.constant 0 : index
      %c0_23 = arith.constant 0 : index
      %24 = vector.load %arg9[%c0_22, %c0_23] : memref<8x128xf32, #tpu.memory_space<vmem>>, vector<8x128xf32>
      tpu.vector_store %arg9[%c0_22, %c0_23], %23 {strides = array<i32>} : memref<8x128xf32, #tpu.memory_space<vmem>>, vector<8x128xf32>,
    } else {
    }
    return
  }
  func.func @transform_0(%arg0: i32, %arg1: i32) -> (i32, i32) {
    %c0_i32 = arith.constant 0 : i32
    %c0_i32_0 = arith.constant 0 : i32
    return %c0_i32, %arg1 : i32, i32
  }
  func.func @transform_1(%arg0: i32, %arg1: i32) -> (i32, i32) {
    %c0_i32 = arith.constant 0 : i32
    return %arg1, %arg0 : i32, i32
  }
  func.func @transform_2(%arg0: i32, %arg1: i32) -> (i32, i32) {
    %c0_i32 = arith.constant 0 : i32
    return %arg1, %arg0 : i32, i32
  }
  func.func @transform_3(%arg0: i32, %arg1: i32) -> (i32, i32) {
    %c0_i32 = arith.constant 0 : i32
    return %arg1, %arg0 : i32, i32
  }
  func.func @transform_4(%arg0: i32, %arg1: i32) -> (i32, i32) {
    %c0_i32 = arith.constant 0 : i32
    %c0_i32_0 = arith.constant 0 : i32
    return %c0_i32, %arg0 : i32, i32
  }
  func.func @transform_5(%arg0: i32, %arg1: i32) -> (i32, i32) {
    %c0_i32 = arith.constant 0 : i32
    %c0_i32_0 = arith.constant 0 : i32
    return %c0_i32, %arg0 : i32, i32
  }
  func.func @transform_6(%arg0: i32, %arg1: i32) -> (i32, i32) {
    %c0_i32 = arith.constant 0 : i32
    %c0_i32_0 = arith.constant 0 : i32
    return %c0_i32, %arg0 : i32, i32
  }
  func.func @transform_7(%arg0: i32, %arg1: i32) -> (i32, i32) {
    %c0_i32 = arith.constant 0 : i32
    %c0_i32_0 = arith.constant 0 : i32
    return %c0_i32, %arg0 : i32, i32
  }
}

</mosaic_0001>

<bundles_post_ra>
// kernel: tpu_custom_call.1
= control target key start
LH: loop header
LB: loop body
LE: loop exit
PB: predicated region body
PF: predicated region fallthrough
CT: control target
= control target key end

     0   :  { %12 = vsyncpa [#allocation4], 0  ;;  %s436_s0 = inlined_call_operand.hbm [shape: f32[8,128], index: 0, kind: input, shape index: {}]   ;;  %s437_s1 = inlined_call_operand.hbm [shape: f32[128,128], index: 1, kind: input, shape index: {}]   ;;  %s438_s2 = inlined_call_operand.hbm [shape: f32[128,128], index: 2, kind: input, shape index: {}]   ;;  %s439_s3 = inlined_call_operand.hbm [shape: f32[128,128], index: 3, kind: input, shape index: {}]   ;;  %s440_s4 = inlined_call_operand.vmem [shape: f32[1,128], index: 4, kind: input, shape index: {}]   ;;  %s441_s5 = inlined_call_operand.vmem [shape: f32[1,128], index: 5, kind: input, shape index: {}]   ;;  %s442_s6 = inlined_call_operand.vmem [shape: f32[1,128], index: 6, kind: input, shape index: {}]   ;;  %s443_s7 = inlined_call_operand.hbm [shape: f32[8,128], index: 7, kind: output, shape index: {}]  }
   0x1   :  { %13 = vsyncpa [#allocation7], 0 }
   0x2   :  { %14 = vsyncpa [#allocation10], 0  ;;  %s31_s26 = sshll.u32 %s437_s1, 4  ;;  %s32_s26 = int_to_ptr.hbm [resolvable:$true] %s31_s26 }
   0x3   :  { %15 = vsyncpa [#allocation5], 0  ;;  %s365_s27 = smov [#allocation6]   ;;  %s21_s8 = sshll.u32 %s436_s0, 4  ;;  %s22_s8 = int_to_ptr.hbm [resolvable:$true] %s21_s8 }
   0x4   :  { %s33_s28 = sshll.u32 %s365_s27, 4  ;;  %s366_s9 = smov 128   ;;  %s34_s28 = int_to_ptr.vmem [resolvable:$true] %s33_s28 }
   0x5   :  { %s367_s10 = smov 8   ;;  %s368_s11 = smov [#allocation3]  }
   0x6   :  { %39 = dma.hbm_to_vmem [thread:$0]  %s32_s26, 2048, %s34_s28, [#allocation7], %s366_s9, %s366_s9, %s367_s10  }
   0x7   :  { %s23_s12 = sshll.u32 %s368_s11, 4  ;;  %s44_s15 = sshll.u32 %s438_s2, 4  ;;  %s24_s12 = int_to_ptr.vmem [resolvable:$true] %s23_s12  ;;  %s45_s15 = int_to_ptr.hbm [resolvable:$true] %s44_s15 }
   0x8   :  { %26 = dma.hbm_to_vmem [thread:$0]  %s22_s8, 128, %s24_s12, [#allocation4]  }
   0x9   :  { %s57_s17 = sshll.u32 %s439_s3, 4  ;;  %s369_s18 = smov [#allocation8]   ;;  %s58_s17 = int_to_ptr.hbm [resolvable:$true] %s57_s17 }
   0xa   :  { %s46_s19 = sshll.u32 %s369_s18, 4  ;;  %s370_s0 = smov [#allocation9]   ;;  %s47_s19 = int_to_ptr.vmem [resolvable:$true] %s46_s19 }
   0xb   :  { %52 = dma.hbm_to_vmem [thread:$0]  %s45_s15, 2048, %s47_s19, [#allocation7], %s366_s9, %s366_s9, %s367_s10  }
   0xc   :  { %s59_s20 = sshll.u32 %s370_s0, 4  ;;  %s60_s20 = int_to_ptr.vmem [resolvable:$true] %s59_s20 }
   0xd   :  { %65 = dma.hbm_to_vmem [thread:$0]  %s58_s17, 2048, %s60_s20, [#allocation10], %s366_s9, %s366_s9, %s367_s10  }
   0xe   :  { %357 = dma.done.wait [#allocation4], 128  }
   0xf   :  { %358 = vsyncadd [#allocation4], 4294967168 }
  0x10   :  { %359 = dma.done.wait [#allocation7], 4096  }
  0x11   :  { %360 = vsyncadd [#allocation7], 4294963200 }
  0x12   :  { %361 = dma.done.wait [#allocation10], 2048  }
  0x13   :  { %362 = vsyncadd [#allocation10], 4294965248  ;;  %v108_v0 = vld [vmem:[#allocation6 + $0x78] sm:$0xff]  ;;  %v107_v4 = vld [vmem:[#allocation6 + $0x70] sm:$0xff]  ;;  %s371_s25 = smov [#allocation11]   ;;  %s218_s29 = sshll.u32 %s443_s7, 4  ;;  %s219_s29 = int_to_ptr.hbm [resolvable:$true] %s218_s29 }
  0x14   :  { %v124_v1 = vld [vmem:[#allocation8 + $0x78] sm:$0xff]  ;;  %v123_v5 = vld [vmem:[#allocation8 + $0x70] sm:$0xff]  ;;  %v106_v8 = vld [vmem:[#allocation6 + $0x68] sm:$0xff]  ;;  %s216_s26 = sshll.u32 %s371_s25, 4  ;;  %s217_s26 = int_to_ptr.vmem [resolvable:$true] %s216_s26 }
  0x15   :  { %v140_v2 = vld [vmem:[#allocation9 + $0x78] sm:$0xff]  ;;  %v139_v6 = vld [vmem:[#allocation9 + $0x70] sm:$0xff]  ;;  %v122_v9 = vld [vmem:[#allocation8 + $0x68] sm:$0xff] }
  0x16   :  { %v156_v3 = vmul.f32 %v140_v2, %v124_v1  ;;  %v155_v7 = vmul.f32 %v139_v6, %v123_v5  ;;  %v138_v10 = vld [vmem:[#allocation9 + $0x68] sm:$0xff]  ;;  %v121_v13 = vld [vmem:[#allocation8 + $0x60] sm:$0xff]  ;;  %v120_v18 = vld [vmem:[#allocation8 + $0x58] sm:$0xff] }
  0x17   :  { %v154_v12 = vmul.f32 %v138_v10, %v122_v9  ;;  %v137_v14 = vld [vmem:[#allocation9 + $0x60] sm:$0xff]  ;;  %v136_v19 = vld [vmem:[#allocation9 + $0x58] sm:$0xff]  ;;  %v119_v22 = vld [vmem:[#allocation8 + $0x50] sm:$0xff] }
  0x18   :  { %v172_v11 = vadd.f32 %v156_v3, %v108_v0  ;;  %v171_v15 = vadd.f32 %v155_v7, %v107_v4  ;;  %v105_v16 = vld [vmem:[#allocation6 + $0x60] sm:$0xff]  ;;  %v153_v17 = vmul.f32 %v137_v14, %v121_v13  ;;  %v152_v21 = vmul.f32 %v136_v19, %v120_v18  ;;  %v135_v23 = vld [vmem:[#allocation9 + $0x50] sm:$0xff]  ;;  %v104_v24 = vld [vmem:[#allocation6 + $0x58] sm:$0xff] }
  0x19   :  { %v170_v20 = vadd.f32 %v154_v12, %v106_v8  ;;  %v118_v25 = vld [vmem:[#allocation8 + $0x48] sm:$0xff]  ;;  %v151_v28 = vmul.f32 %v135_v23, %v119_v22  ;;  %v103_v29 = vld [vmem:[#allocation6 + $0x50] sm:$0xff]  ;;  %v117_v30 = vld [vmem:[#allocation8 + $0x40] sm:$0xff] }
  0x1a   :  { %175 = vmatpush.msra.mxu0 %v172_v11  ;;  %v134_v26 = vld [vmem:[#allocation9 + $0x48] sm:$0xff]  ;;  %v169_v27 = vadd.f32 %v153_v17, %v105_v16  ;;  %v133_v31 = vld [vmem:[#allocation9 + $0x40] sm:$0xff]  ;;  %v168_v32 = vadd.f32 %v152_v21, %v104_v24  ;;  %v116_v35 = vld [vmem:[#allocation8 + $0x38] sm:$0xff] }
  0x1b   :  { %v150_v33 = vmul.f32 %v134_v26, %v118_v25  ;;  %v102_v34 = vld [vmem:[#allocation6 + $0x48] sm:$0xff]  ;;  %v132_v36 = vld [vmem:[#allocation9 + $0x38] sm:$0xff]  ;;  %v167_v37 = vadd.f32 %v151_v28, %v103_v29  ;;  %v149_v38 = vmul.f32 %v133_v31, %v117_v30  ;;  %v101_v39 = vld [vmem:[#allocation6 + $0x40] sm:$0xff] }
  0x1c   :  { %176 = vmatpush.msra.mxu0 %v171_v15  ;;  %v115_v40 = vld [vmem:[#allocation8 + $0x30] sm:$0xff]  ;;  %v148_v43 = vmul.f32 %v132_v36, %v116_v35  ;;  %v100_v44 = vld [vmem:[#allocation6 + $0x38] sm:$0xff]  ;;  %v114_v45 = vld [vmem:[#allocation8 + $0x28] sm:$0xff] }
  0x1d   :  { %v131_v41 = vld [vmem:[#allocation9 + $0x30] sm:$0xff]  ;;  %v166_v42 = vadd.f32 %v150_v33, %v102_v34  ;;  %v130_v46 = vld [vmem:[#allocation9 + $0x28] sm:$0xff]  ;;  %v165_v47 = vadd.f32 %v149_v38, %v101_v39  ;;  %v113_v50 = vld [vmem:[#allocation8 + $0x20] sm:$0xff] }
  0x1e   :  { %177 = vmatpush.msra.mxu0 %v170_v20  ;;  %v147_v48 = vmul.f32 %v131_v41, %v115_v40  ;;  %v99_v49 = vld [vmem:[#allocation6 + $0x30] sm:$0xff]  ;;  %v129_v51 = vld [vmem:[#allocation9 + $0x20] sm:$0xff]  ;;  %v164_v52 = vadd.f32 %v148_v43, %v100_v44  ;;  %v146_v53 = vmul.f32 %v130_v46, %v114_v45  ;;  %v98_v54 = vld [vmem:[#allocation6 + $0x28] sm:$0xff] }
  0x1f   :  { %v112_v55 = vld [vmem:[#allocation8 + $0x18] sm:$0xff]  ;;  %v145_v58 = vmul.f32 %v129_v51, %v113_v50  ;;  %v97_v59 = vld [vmem:[#allocation6 + $0x20] sm:$0xff]  ;;  %v111_v60 = vld [vmem:[#allocation8 + $0x10] sm:$0xff] }
  0x20   :  { %178 = vmatpush.msra.mxu0 %v169_v27  ;;  %v128_v56 = vld [vmem:[#allocation9 + $0x18] sm:$0xff]  ;;  %v163_v57 = vadd.f32 %v147_v48, %v99_v49  ;;  %v127_v61 = vld [vmem:[#allocation9 + $0x10] sm:$0xff]  ;;  %v162_v62 = vadd.f32 %v146_v53, %v98_v54  ;;  %v110_v1 = vld [vmem:[#allocation8 + $0x8] sm:$0xff] }
  0x21   :  { %v144_v63 = vmul.f32 %v128_v56, %v112_v55  ;;  %v96_v0 = vld [vmem:[#allocation6 + $0x18] sm:$0xff]  ;;  %v126_v2 = vld [vmem:[#allocation9 + $0x8] sm:$0xff]  ;;  %v161_v3 = vadd.f32 %v145_v58, %v97_v59  ;;  %v143_v4 = vmul.f32 %v127_v61, %v111_v60  ;;  %v95_v5 = vld [vmem:[#allocation6 + $0x10] sm:$0xff] }
  0x22   :  { %179 = vmatpush.msra.mxu0 %v168_v32  ;;  %v109_v6 = vld [vmem:[#allocation8] sm:$0xff]  ;;  %v142_v9 = vmul.f32 %v126_v2, %v110_v1  ;;  %v94_v10 = vld [vmem:[#allocation6 + $0x8] sm:$0xff]  ;;  %v174_v16 = vld [vmem:[#allocation3] sm:$0xff] }
  0x23   :  { %v125_v7 = vld [vmem:[#allocation9] sm:$0xff]  ;;  %v160_v8 = vadd.f32 %v144_v63, %v96_v0  ;;  %v159_v11 = vadd.f32 %v143_v4, %v95_v5  ;;  %v201_v17 = vld [vmem:[%s441_s5] sm:$0x1] }
  0x24   :  { %180 = vmatpush.msra.mxu0 %v167_v37  ;;  %v141_v12 = vmul.f32 %v125_v7, %v109_v6  ;;  %v93_v13 = vld [vmem:[#allocation6] sm:$0xff]  ;;  %v158_v14 = vadd.f32 %v142_v9, %v94_v10  ;;  %v202_v18 = vld [vmem:[%s442_s6] sm:$0x1] }
  0x25   :  { %v203_v19 = vmul.f32 %v202_v18, %v201_v17  ;;  %v200_v20 = vld [vmem:[%s440_s4] sm:$0x1] }
  0x26   :  { %181 = vmatpush.msra.mxu0 %v166_v42  ;;  %v157_v15 = vadd.f32 %v141_v12, %v93_v13 }
  0x27   :  { %v204_v21 = vadd.f32 %v203_v19, %v200_v20 }
  0x28   :  { %182 = vmatpush.msra.mxu0 %v165_v47 }
  0x29   :  { %v207_v22 = vperm.slane %v204_v21, 0 }
  0x2a   :  { %183 = vmatpush.msra.mxu0 %v164_v52 }
  0x2c   :  { %184 = vmatpush.msra.mxu0 %v163_v57 }
  0x2e   :  { %185 = vmatpush.msra.mxu0 %v162_v62 }
  0x30   :  { %186 = vmatpush.msra.mxu0 %v161_v3 }
  0x32   :  { %187 = vmatpush.msra.mxu0 %v160_v8 }
  0x34   :  { %188 = vmatpush.msra.mxu0 %v159_v11 }
  0x36   :  { %189 = vmatpush.msra.mxu0 %v158_v14 }
  0x38   :  { %190 = vmatpush.msra.mxu0 %v157_v15 }
  0x39   :  { %191 = vmatmul.f32.vlgmr.msra.gmra.mxu0 %v174_v16 }
  0xb6   :  { %v192_v23 = vpop.f32.mrf.mxu0 }
  0xb7   :  { %v209_v24 = vadd.f32 %v207_v22, %v192_v23 }
  0xb9   :  { %210 = vst [vmem:[#allocation11] sm:$0xff] %v209_v24 }
  0xba   :  { %221 = dma.vmem_to_hbm [thread:$0]  %s217_s26, 128, %s219_s29, [#allocation5]  }
  0xbb   :  { %363 = dma.done.wait [#allocation5], 128  }
  0xbc   :  { %364 = vsyncadd [#allocation5], 4294967168 }
  0xbd   :  { %226 = vsyncpa [#allocation4], 1 }
  0xbe   :  { %227 = vsyncpa [#allocation7], 1 }
  0xbf   :  { %228 = vsyncpa [#allocation10], 1 }
  0xc0   :  { %229 = vsyncpa [#allocation5], 1 }

</bundles_post_ra>
